<compile_context>
chip_gen: v7x
topology: tpu7x:2x2x1
jax: 0.10.0
libtpu: 0.0.40
codegen_flags: <defaults>
</compile_context>

<pallas_src>
import math

import jax
import jax.numpy as jnp
import numpy as np
from jax.experimental import pallas as pl
from jax.experimental.pallas import tpu as pltpu


def _make_decoder_kernel(num_layers, matmul_dtype=None):
    """Kernel args: (x_ref, w0_ref, b0_ref, ..., w_{L-1}_ref, b_{L-1}_ref, y_ref)."""

    def kernel(*refs):
        x_ref = refs[0]
        y_ref = refs[-1]
        h = x_ref[...]
        for li in range(num_layers):
            w_ref = refs[1 + 2 * li]
            b_ref = refs[2 + 2 * li]
            lhs = h.astype(matmul_dtype) if matmul_dtype is not None else h
            # MXU matmul with f32 accumulation; bias add + activation in f32.
            h = jnp.dot(lhs, w_ref[...], preferred_element_type=jnp.float32)
            h = h + b_ref[...]
            if li < num_layers - 1:
                h = jnp.tanh(h)
            else:
                h = jnp.exp(h)
        y_ref[...] = h.astype(y_ref.dtype)

    return kernel


def decoder_forward(x, params, *, batch_tile=None, matmul_dtype=None):
    """x: [B, D_in] float32. params: tuple of (w, b) with w [in, out], b [1, out]."""
    num_layers = len(params)
    B, D_in = x.shape
    assert params[0][0].shape[0] == D_in
    D_out = params[-1][0].shape[1]

    # Grid: a single invocation for small/medium batches (per-step overhead
    # dominates this ~150 KFLOP network); tile at 512 rows only when the batch
    # is large enough to amortize the fixed per-step cost.
    if batch_tile is None:
        TB = B if B <= 512 else 512
    else:
        TB = min(batch_tile, B)
    n_tiles = pl.cdiv(B, TB)
    B_pad = n_tiles * TB
    x_in = x if B_pad == B else jnp.pad(x, ((0, B_pad - B), (0, 0)))

    if matmul_dtype is not None:
        x_in = x_in.astype(matmul_dtype)

    flat_params = []
    in_specs = [pl.BlockSpec((TB, D_in), lambda i: (i, 0))]   # batch-tiled input
    for (w, b) in params:
        if matmul_dtype is not None:
            w = w.astype(matmul_dtype)
        flat_params += [w, b]
        # Weights/biases are tiny (<20 KB total): keep them as full VMEM blocks.
        in_specs += [
            pl.BlockSpec(w.shape, lambda i: (0, 0)),
            pl.BlockSpec(b.shape, lambda i: (0, 0)),
        ]

    kernel = _make_decoder_kernel(num_layers, matmul_dtype)

    y = pl.pallas_call(
        kernel,
        out_shape=jax.ShapeDtypeStruct((B_pad, D_out), jnp.float32),
        grid_spec=pltpu.PrefetchScalarGridSpec(
            num_scalar_prefetch=0,
            grid=(n_tiles,),
            in_specs=in_specs,
            out_specs=pl.BlockSpec((TB, D_out), lambda i: (i, 0)),
        ),
        compiler_params=pltpu.CompilerParams(
            dimension_semantics=("parallel",)),
    )(x_in, *flat_params)

    return y[:B] if B_pad != B else y


def init_params(key, num_layers, layer_size_list_struct):
    """Deterministic PyTorch-Linear-style init: U(-1/sqrt(fan_in), 1/sqrt(fan_in)).
    Weights returned as [in, out] (already transposed for x @ W), in the same
    order the Decoder builds its layers (reverse over layer_size_list_struct)."""
    params = []
    for i in np.arange(num_layers, 0, -1):
        fan_in = int(layer_size_list_struct[i])
        fan_out = int(layer_size_list_struct[i - 1])
        key, kw, kb = jax.random.split(key, 3)
        bound = 1.0 / math.sqrt(fan_in)
        w = jax.random.uniform(kw, (fan_in, fan_out), jnp.float32, -bound, bound)
        b = jax.random.uniform(kb, (1, fan_out), jnp.float32, -bound, bound)
        params.append((w, b))
    return tuple(params)


def reference_forward(x, params):
    y = x
    for li, (w, b) in enumerate(params):
        y = y @ w + b
        if li < len(params) - 1:
            y = jnp.tanh(y)
    return jnp.exp(y)


if __name__ == "__main__":
    # Module config: num_layers = 3, layer_size_list_struct = [32, 64, 32, 8]
    #   -> Linear(8,32)+tanh, Linear(32,64)+tanh, Linear(64,32), exp.
    num_layers = 3
    layer_size_list_struct = [32, 64, 32, 8]
    latent_dim = layer_size_list_struct[num_layers]    # decoder input width = 8
    out_dim = layer_size_list_struct[0]                # decoder output width = 32

    B = 16
    key = jax.random.PRNGKey(0)
    key, kx = jax.random.split(key)
    sample = jax.random.normal(kx, (B, latent_dim), jnp.float32)

    params = init_params(jax.random.PRNGKey(0), num_layers, layer_size_list_struct)

    y = decoder_forward(sample, params)
    jax.block_until_ready(y)

    y_ref = reference_forward(sample, params)

    assert y.shape == (B, out_dim)
    np.testing.assert_allclose(np.asarray(y), np.asarray(y_ref), rtol=1e-5, atol=1e-5)

    print("KERNEL_OK")
</pallas_src>

<mosaic_0001>
module attributes {stable_mosaic.version = 11 : i64} {
  func.func @kernel(%arg0: i32, %arg1: memref<16x8xf32, #tpu.memory_space<vmem>>, %arg2: memref<8x32xf32, #tpu.memory_space<vmem>>, %arg3: memref<1x32xf32, #tpu.memory_space<vmem>>, %arg4: memref<32x64xf32, #tpu.memory_space<vmem>>, %arg5: memref<1x64xf32, #tpu.memory_space<vmem>>, %arg6: memref<64x32xf32, #tpu.memory_space<vmem>>, %arg7: memref<1x32xf32, #tpu.memory_space<vmem>>, %arg8: memref<16x32xf32, #tpu.memory_space<vmem>>) attributes {dimension_semantics = [#tpu.dimension_semantics<parallel>], iteration_bounds = array<i64: 1>, scalar_prefetch = 0 : i64, scratch_operands = 0 : i64, tpu.core_type = #tpu.core_type<tc>, window_params = [{transform_indices = @transform_0, window_bounds = array<i64: 16, 8>}, {pipeline_mode = #tpu.pipeline_mode<synchronous>, transform_indices = @transform_1, window_bounds = array<i64: 8, 32>}, {pipeline_mode = #tpu.pipeline_mode<synchronous>, transform_indices = @transform_2, window_bounds = array<i64: 1, 32>}, {pipeline_mode = #tpu.pipeline_mode<synchronous>, transform_indices = @transform_3, window_bounds = array<i64: 32, 64>}, {pipeline_mode = #tpu.pipeline_mode<synchronous>, transform_indices = @transform_4, window_bounds = array<i64: 1, 64>}, {pipeline_mode = #tpu.pipeline_mode<synchronous>, transform_indices = @transform_5, window_bounds = array<i64: 64, 32>}, {pipeline_mode = #tpu.pipeline_mode<synchronous>, transform_indices = @transform_6, window_bounds = array<i64: 1, 32>}, {transform_indices = @transform_7, window_bounds = array<i64: 16, 32>}]} {
    %c0 = arith.constant 0 : index
    %c0_0 = arith.constant 0 : index
    %0 = vector.load %arg1[%c0, %c0_0] : memref<16x8xf32, #tpu.memory_space<vmem>>, vector<16x8xf32>
    %c0_1 = arith.constant 0 : index
    %c0_2 = arith.constant 0 : index
    %1 = vector.load %arg2[%c0_1, %c0_2] : memref<8x32xf32, #tpu.memory_space<vmem>>, vector<8x32xf32>
    %cst = arith.constant dense<0.000000e+00> : vector<16x32xf32>
    %2 = tpu.matmul %0, %1, %cst {dimension_numbers = #tpu.dot_dimension_numbers<[1], [0], [0], [1], [0, 0, 1, 1], [], []>} : vector<16x8xf32>, vector<8x32xf32>, vector<16x32xf32> -> vector<16x32xf32>
    %c0_3 = arith.constant 0 : index
    %c0_4 = arith.constant 0 : index
    %3 = vector.load %arg3[%c0_3, %c0_4] : memref<1x32xf32, #tpu.memory_space<vmem>>, vector<1x32xf32>
    %4 = vector.broadcast %3 : vector<1x32xf32> to vector<16x32xf32>
    %5 = arith.addf %2, %4 : vector<16x32xf32>
    %6 = math.tanh %5 : vector<16x32xf32>
    %c0_5 = arith.constant 0 : index
    %c0_6 = arith.constant 0 : index
    %7 = vector.load %arg4[%c0_5, %c0_6] : memref<32x64xf32, #tpu.memory_space<vmem>>, vector<32x64xf32>
    %cst_7 = arith.constant dense<0.000000e+00> : vector<16x64xf32>
    %8 = tpu.matmul %6, %7, %cst_7 {dimension_numbers = #tpu.dot_dimension_numbers<[1], [0], [0], [1], [0, 0, 1, 1], [], []>} : vector<16x32xf32>, vector<32x64xf32>, vector<16x64xf32> -> vector<16x64xf32>
    %c0_8 = arith.constant 0 : index
    %c0_9 = arith.constant 0 : index
    %9 = vector.load %arg5[%c0_8, %c0_9] : memref<1x64xf32, #tpu.memory_space<vmem>>, vector<1x64xf32>
    %10 = vector.broadcast %9 : vector<1x64xf32> to vector<16x64xf32>
    %11 = arith.addf %8, %10 : vector<16x64xf32>
    %12 = math.tanh %11 : vector<16x64xf32>
    %c0_10 = arith.constant 0 : index
    %c0_11 = arith.constant 0 : index
    %13 = vector.load %arg6[%c0_10, %c0_11] : memref<64x32xf32, #tpu.memory_space<vmem>>, vector<64x32xf32>
    %cst_12 = arith.constant dense<0.000000e+00> : vector<16x32xf32>
    %14 = tpu.matmul %12, %13, %cst_12 {dimension_numbers = #tpu.dot_dimension_numbers<[1], [0], [0], [1], [0, 0, 1, 1], [], []>} : vector<16x64xf32>, vector<64x32xf32>, vector<16x32xf32> -> vector<16x32xf32>
    %c0_13 = arith.constant 0 : index
    %c0_14 = arith.constant 0 : index
    %15 = vector.load %arg7[%c0_13, %c0_14] : memref<1x32xf32, #tpu.memory_space<vmem>>, vector<1x32xf32>
    %16 = vector.broadcast %15 : vector<1x32xf32> to vector<16x32xf32>
    %17 = arith.addf %14, %16 : vector<16x32xf32>
    %18 = math.exp %17 : vector<16x32xf32>
    %c0_15 = arith.constant 0 : index
    %c0_16 = arith.constant 0 : index
    %19 = vector.load %arg8[%c0_15, %c0_16] : memref<16x32xf32, #tpu.memory_space<vmem>>, vector<16x32xf32>
    tpu.vector_store %arg8[%c0_15, %c0_16], %18 {strides = array<i32>} : memref<16x32xf32, #tpu.memory_space<vmem>>, vector<16x32xf32>,
    return
  }
  func.func @transform_0(%arg0: i32) -> (i32, i32) {
    %c0_i32 = arith.constant 0 : i32
    %c0_i32_0 = arith.constant 0 : i32
    return %arg0, %c0_i32 : i32, i32
  }
  func.func @transform_1(%arg0: i32) -> (i32, i32) {
    %c0_i32 = arith.constant 0 : i32
    %c0_i32_0 = arith.constant 0 : i32
    %c0_i32_1 = arith.constant 0 : i32
    return %c0_i32, %c0_i32_0 : i32, i32
  }
  func.func @transform_2(%arg0: i32) -> (i32, i32) {
    %c0_i32 = arith.constant 0 : i32
    %c0_i32_0 = arith.constant 0 : i32
    %c0_i32_1 = arith.constant 0 : i32
    return %c0_i32, %c0_i32_0 : i32, i32
  }
  func.func @transform_3(%arg0: i32) -> (i32, i32) {
    %c0_i32 = arith.constant 0 : i32
    %c0_i32_0 = arith.constant 0 : i32
    %c0_i32_1 = arith.constant 0 : i32
    return %c0_i32, %c0_i32_0 : i32, i32
  }
  func.func @transform_4(%arg0: i32) -> (i32, i32) {
    %c0_i32 = arith.constant 0 : i32
    %c0_i32_0 = arith.constant 0 : i32
    %c0_i32_1 = arith.constant 0 : i32
    return %c0_i32, %c0_i32_0 : i32, i32
  }
  func.func @transform_5(%arg0: i32) -> (i32, i32) {
    %c0_i32 = arith.constant 0 : i32
    %c0_i32_0 = arith.constant 0 : i32
    %c0_i32_1 = arith.constant 0 : i32
    return %c0_i32, %c0_i32_0 : i32, i32
  }
  func.func @transform_6(%arg0: i32) -> (i32, i32) {
    %c0_i32 = arith.constant 0 : i32
    %c0_i32_0 = arith.constant 0 : i32
    %c0_i32_1 = arith.constant 0 : i32
    return %c0_i32, %c0_i32_0 : i32, i32
  }
  func.func @transform_7(%arg0: i32) -> (i32, i32) {
    %c0_i32 = arith.constant 0 : i32
    %c0_i32_0 = arith.constant 0 : i32
    return %arg0, %c0_i32 : i32, i32
  }
}

</mosaic_0001>

<bundles_post_ra>
// kernel: tpu_custom_call.1
= control target key start
LH: loop header
LB: loop body
LE: loop exit
PB: predicated region body
PF: predicated region fallthrough
CT: control target
= control target key end

     0   :  { %vm37_vm0 = vcmask 64512   ;;  %s574_s0 = inlined_call_operand.vmem [shape: f32[16,8], index: 0, kind: input, shape index: {}]   ;;  %s575_s1 = inlined_call_operand.vmem [shape: f32[8,32], index: 1, kind: input, shape index: {}]   ;;  %s576_s2 = inlined_call_operand.vmem [shape: f32[1,32], index: 2, kind: input, shape index: {}]   ;;  %s577_s3 = inlined_call_operand.vmem [shape: f32[32,64], index: 3, kind: input, shape index: {}]   ;;  %s578_s4 = inlined_call_operand.vmem [shape: f32[1,64], index: 4, kind: input, shape index: {}]   ;;  %s579_s5 = inlined_call_operand.vmem [shape: f32[64,32], index: 5, kind: input, shape index: {}]   ;;  %s580_s6 = inlined_call_operand.vmem [shape: f32[1,32], index: 6, kind: input, shape index: {}]   ;;  %s581_s7 = inlined_call_operand.hbm [shape: f32[16,32], index: 7, kind: output, shape index: {}]  }
   0x1   :  { %v29_v0 = vld [vmem:[%s575_s1] sm:$0xff]  ;;  %v28_v2 = vld [vmem:[%s574_s0 + $0x8] sm:$0xff] }
   0x2   :  { %v27_v1 = vld [vmem:[%s574_s0] sm:$0xff]  ;;  %363 = vmatprep.subr.mxu1 %v29_v0 }
   0x3   :  { %365 = vmatprep.mubr.msk.f32.mxu1 %vm37_vm0, %v27_v1 }
   0x4   :  { %12 = vsyncpa [#allocation3], 0  ;;  %364 = vmatpush3.msra.mxu1 %v29_v0  ;;  %v121_v3 = vld [vmem:[%s577_s3] sm:$0xff]  ;;  %v122_v4 = vld [vmem:[%s577_s3 + $0x8] sm:$0xff]  ;;  %vm132_vm1 = vcmask 261120   ;;  %vm231_vm2 = vcmask 523264  }
   0x5   :  { %366 = vmatmul.mubr.msk.f32.vlgmr.msra.gmra.mrb[0].mxu1 %vm37_vm0, %v28_v2  ;;  %v123_v5 = vld [vmem:[%s577_s3 + $0x10] sm:$0xff]  ;;  %v398_v6 = vpack.c.bf16 %v122_v4, %v121_v3  ;;  %v124_v7 = vld [vmem:[%s577_s3 + $0x18] sm:$0xff]  ;;  %v335_v9 = vld [vmem:[%s576_s2] ss:$0 sm:$0xff] }
   0x6   :  { %v402_v8 = vpack.c.bf16 %v124_v7, %v123_v5  ;;  %v216_v16 = vld [vmem:[%s579_s5] sm:$0xff]  ;;  %v217_v17 = vld [vmem:[%s579_s5 + $0x8] sm:$0xff]  ;;  %v218_v19 = vld [vmem:[%s579_s5 + $0x10] sm:$0xff] }
   0x7   :  { %399 = vmatprep.subr.bf16.mxu1 %v398_v6  ;;  %v406_v18 = vpack.c.bf16 %v217_v17, %v216_v16  ;;  %v219_v20 = vld [vmem:[%s579_s5 + $0x18] sm:$0xff]  ;;  %v220_v22 = vld [vmem:[%s579_s5 + $0x20] sm:$0xff]  ;;  %v221_v23 = vld [vmem:[%s579_s5 + $0x28] sm:$0xff] }
   0x8   :  { %401 = vmatpush3.bf16.msra.mxu1 %v398_v6  ;;  %v410_v21 = vpack.c.bf16 %v219_v20, %v218_v19  ;;  %v222_v24 = vld [vmem:[%s579_s5 + $0x30] sm:$0xff]  ;;  %v414_v25 = vpack.c.bf16 %v221_v23, %v220_v22  ;;  %v223_v26 = vld [vmem:[%s579_s5 + $0x38] sm:$0xff]  ;;  %v338_v28 = vld [vmem:[%s578_s4] ss:$0 sm:$0xff]  ;;  %s461_s4 = smov [#allocation2]  }
   0x9   :  { %403 = vmatprep.subr.bf16.mxu1 %v402_v8  ;;  %407 = vmatprep.subr.bf16.mxu0 %v406_v18  ;;  %v418_v27 = vpack.c.bf16 %v223_v26, %v222_v24  ;;  %v341_v35 = vld [vmem:[%s580_s6] ss:$0 sm:$0xff]  ;;  %s324_s9 = sshll.u32 %s461_s4, 4  ;;  %s325_s9 = int_to_ptr.vmem [resolvable:$true] %s324_s9 }
   0xa   :  { %409 = vmatpush3.bf16.msra.mxu0 %v406_v18  ;;  %s437_s1 = scalar_lea.vmem %s325_s9, 256  ;;  %p442_p1 = scmp.lt.s32.totalorder %s325_s9, %s325_s9 }
   0xb   :  { %411 = vmatprep.subr.bf16.mxu0 %v410_v21  ;;  %p438_p0 = scmp.ne.s32.totalorder %s325_s9, %s437_s1  ;;  %p443_p2 = scmp.lt.s32.totalorder %s437_s1, %s437_s1 }
   0xc   :  { %405 = vmatpush3.bf16.msra.mxu1 %v402_v8 }
   0xd   :  { %p444_p3 = por %p443_p2, %p442_p1 }
   0xe   :  { %413 = vmatpush3.bf16.msra.mxu0 %v410_v21 }
   0xf   :  { %415 = vmatprep.subr.bf16.mxu0 %v414_v25  ;;  %p445_p4 = pnand %p444_p3, %p438_p0 }
  0x12   :  { %417 = vmatpush3.bf16.msra.mxu0 %v414_v25 }
  0x13   :  { %419 = vmatprep.subr.bf16.mxu0 %v418_v27 }
  0x16   :  { %421 = vmatpush3.bf16.msra.mxu0 %v418_v27 }
  0xd8   :  { %v367_v10 = vpop.f32.mrb[0].mxu1 }
  0xd9   :  { %v116_v11 = vadd.f32 %v367_v10, %v335_v9  ;;  %v110_v12 = vpop.f32.mrb[1].mxu1 }
  0xda   :  { %v111_v13 = vadd.f32 %v335_v9, %v110_v12 }
  0xdc   :  { %425 = vtanh.f32 %v111_v13 }
  0xdd   :  { %427 = vtanh.f32 %v116_v11 }
  0xe6   :  { %v426_v14 = vpop.eup %425 }
  0xe7   :  { %v428_v15 = vpop.eup %427  ;;  %376 = vmatprep.mubr.msk.f32.mxu1 %vm132_vm1, %v426_v14 }
  0xe8   :  { %377 = vmatmul.mubr.msk.f32.vlgmr.msra.gmra.mrb[2].mxu1 %vm132_vm1, %v428_v15 }
 0x1bb   :  { %v378_v29 = vpop.f32.mrb[2].mxu1 }
 0x1bc   :  { %v211_v30 = vadd.f32 %v378_v29, %v338_v28  ;;  %v205_v31 = vpop.f32.mrb[3].mxu1 }
 0x1bd   :  { %v206_v32 = vadd.f32 %v338_v28, %v205_v31 }
 0x1bf   :  { %429 = vtanh.f32 %v206_v32 }
 0x1c0   :  { %431 = vtanh.f32 %v211_v30 }
 0x1c9   :  { %v430_v33 = vpop.eup %429 }
 0x1ca   :  { %v432_v34 = vpop.eup %431  ;;  %395 = vmatprep.mubr.msk.f32.mxu0 %vm231_vm2, %v430_v33 }
 0x1cb   :  { %396 = vmatmul.mubr.msk.f32.vlgmr.msra.gmra.mrb[0].mxu0 %vm231_vm2, %v432_v34 }
 0x29e   :  { %v397_v36 = vpop.f32.mrb[0].mxu0 }
 0x29f   :  { %v310_v37 = vadd.f32 %v397_v36, %v341_v35  ;;  %v304_v38 = vpop.f32.mrb[1].mxu0 }
 0x2a0   :  { %v305_v39 = vadd.f32 %v341_v35, %v304_v38 }
 0x2a1   :  { %v315_v40 = vmul.f32 1.442695, %v310_v37 }
 0x2a2   :  { %v313_v41 = vmul.f32 1.442695, %v305_v39 }
 0x2a3   :  { %433 = vpow2.f32 %v315_v40 }
 0x2a4   :  { %435 = vpow2.f32 %v313_v41 }
 0x2ad   :  { %v434_v42 = vpop.eup %433 }
 0x2ae   :  { %v436_v43 = vpop.eup %435  ;;  %318 = vst.msk [vmem:[#allocation2 + $0x8] sm:$0xff] %vm132_vm1, %v434_v42 }
 0x2af   :  { %317 = vst.msk [vmem:[#allocation2] sm:$0xff] %vm132_vm1, %v436_v43 }
 0x2b0   :  { %448 = shalt.err (!%p445_p4)
}
 0x2b1   :  { %s449_s11 = scalar_lea.hbm %s581_s7, 256 }
 0x2b2   :  { %p450_p5 = scmp.ne.s32.totalorder %s581_s7, %s449_s11  ;;  %p453_p6 = scmp.lt.u32.totalorder %s449_s11, %s581_s7 }
 0x2b4   :  { %p455_p7 = pnand %p453_p6, %p450_p5 }
 0x2b6   :  { %458 = shalt.err (!%p455_p7)
}
 0x2b7   :  { %s462_s3 = smov 128   ;;  %s463_s15 = smov 8  }
 0x2b8   :  { %330 = dma.vmem_to_hbm [thread:$0]  %s325_s9, 256, %s581_s7, [#allocation3], %s462_s3, %s462_s3, %s463_s15  }
 0x2b9   :  { %459 = dma.done.wait [#allocation3], 256  }
 0x2ba   :  { %460 = vsyncadd [#allocation3], 4294967040 }
 0x2bb   :  { %334 = vsyncpa [#allocation3], 1 }

</bundles_post_ra>
